<compile_context>
chip_gen: v5e
topology: v5e:2x2
jax: 0.10.0
libtpu: 0.0.40
codegen_flags: <defaults>
</compile_context>

<pallas_src>
import jax
import jax.numpy as jnp
from jax.experimental import pallas as pl
from jax.experimental.pallas import tpu as pltpu

# Layer output widths of the Critic MLP (obs -> 20 -> 20 -> 20 -> 10 -> 1).
_H1, _H2, _H3, _H4 = 20, 20, 20, 10


def _round_up(n, m):
    return ((n + m - 1) // m) * m


def _param_layout(obs_dim, action_dim):
    """Row offsets of each parameter block inside the packed buffer.

    Weights are stored (out, in); biases are stored as (out, 1) columns at
    column 0. Every block starts at an 8-aligned row (sublane-aligned static
    slices). Padding rows/cols are zero and never read.
    """
    pack_cols = max(_H1, obs_dim, action_dim)
    offs = {}
    r = 0

    def add(name, rows):
        nonlocal r
        offs[name] = r
        r += _round_up(rows, 8)

    add("w1", _H1)       # (20, obs_dim)
    add("w2x", _H2)      # (20, 20)   -- columns of W2 acting on h1
    add("w2a", _H2)      # (20, action_dim) -- columns of W2 acting on a
    add("w3", _H3)       # (20, 20)
    add("w4", _H4)       # (10, 20)
    add("w5", 1)         # (1, 10)
    add("b1", _H1)       # (20, 1)
    add("b2", _H2)
    add("b3", _H3)
    add("b4", _H4)       # (10, 1)
    add("b5", 1)         # (1, 1)
    return offs, r, pack_cols


def _make_critic_kernel(obs_dim, action_dim, offs, a_row_off):
    """Kernel closure with static (Python-int) offsets; batch-in-lanes."""

    def kernel(xa_ref, p_ref, out_ref):
        x = xa_ref[0:obs_dim, :]                                # (obs_dim, TB)
        a = xa_ref[a_row_off:a_row_off + action_dim, :]         # (act_dim, TB)

        w1 = p_ref[offs["w1"]:offs["w1"] + _H1, 0:obs_dim]      # (20, obs_dim)
        w2x = p_ref[offs["w2x"]:offs["w2x"] + _H2, 0:_H1]       # (20, 20)
        w2a = p_ref[offs["w2a"]:offs["w2a"] + _H2, 0:action_dim]
        w3 = p_ref[offs["w3"]:offs["w3"] + _H3, 0:_H2]          # (20, 20)
        w4 = p_ref[offs["w4"]:offs["w4"] + _H4, 0:_H3]          # (10, 20)
        w5 = p_ref[offs["w5"]:offs["w5"] + 1, 0:_H4]            # (1, 10)
        b1 = p_ref[offs["b1"]:offs["b1"] + _H1, 0:1]            # (20, 1)
        b2 = p_ref[offs["b2"]:offs["b2"] + _H2, 0:1]
        b3 = p_ref[offs["b3"]:offs["b3"] + _H3, 0:1]
        b4 = p_ref[offs["b4"]:offs["b4"] + _H4, 0:1]            # (10, 1)
        b5 = p_ref[offs["b5"]:offs["b5"] + 1, 0:1]              # (1, 1)

        # linear1 + relu : (20, TB)
        h1 = jnp.maximum(
            jnp.dot(w1, x, preferred_element_type=jnp.float32) + b1, 0.0)

        # W2 @ concat([h1, a]) == W2x @ h1 + W2a @ a : (20, TB)
        h2 = jnp.maximum(
            jnp.dot(w2x, h1, preferred_element_type=jnp.float32)
            + jnp.dot(w2a, a, preferred_element_type=jnp.float32)
            + b2, 0.0)

        # linear3 + relu : (20, TB)
        h3 = jnp.maximum(
            jnp.dot(w3, h2, preferred_element_type=jnp.float32) + b3, 0.0)

        # linear4 + relu : (10, TB)
        h4 = jnp.maximum(
            jnp.dot(w4, h3, preferred_element_type=jnp.float32) + b4, 0.0)

        # linear5 : (1, TB) -- lane-dense row, stored unmasked.
        q = jnp.dot(w5, h4, preferred_element_type=jnp.float32) + b5
        out_ref[...] = q.astype(out_ref.dtype)

    return kernel


def pack_critic_params(params):
    """Pack all weights/biases into one (n_rows, pack_cols) f32 buffer.

    `params` stores weights (in, out) and biases (1, out) (see
    init_critic_params); here they are transposed to (out, in) / (out, 1)
    so the kernel can compute h = W @ X + b with batch in the lane dim.
    Call ONCE; reuse the packed buffer on every forward.
    """
    w1 = params["w1"]                       # (obs_dim, 20)
    obs_dim = w1.shape[0]
    w2 = params["w2"]                       # (20 + action_dim, 20)
    action_dim = w2.shape[0] - _H1          # split point derived, not hardcoded
    offs, n_rows, pack_cols = _param_layout(obs_dim, action_dim)

    buf = jnp.zeros((n_rows, pack_cols), jnp.float32)

    def put(b, name, arr):
        r, c = arr.shape
        return b.at[offs[name]:offs[name] + r, :c].set(arr.astype(jnp.float32))

    buf = put(buf, "w1", w1.T)              # (20, obs_dim)
    buf = put(buf, "w2x", w2[:_H1, :].T)    # (20, 20)   hoisted W2 split
    buf = put(buf, "w2a", w2[_H1:, :].T)    # (20, action_dim)
    buf = put(buf, "w3", params["w3"].T)    # (20, 20)
    buf = put(buf, "w4", params["w4"].T)    # (10, 20)
    buf = put(buf, "w5", params["w5"].T)    # (1, 10)
    buf = put(buf, "b1", params["b1"].T)    # (20, 1)
    buf = put(buf, "b2", params["b2"].T)
    buf = put(buf, "b3", params["b3"].T)
    buf = put(buf, "b4", params["b4"].T)    # (10, 1)
    buf = put(buf, "b5", params["b5"].T)    # (1, 1)
    return buf


def critic_forward(x, a, packed_params, *, tile_b=1024):
    """x: (B, obs_dim) f32, a: (B, action_dim) f32 -> (B, 1) f32."""
    B, obs_dim = x.shape
    action_dim = a.shape[1]
    offs, n_rows, pack_cols = _param_layout(obs_dim, action_dim)
    assert packed_params.shape == (n_rows, pack_cols)

    # Sublane-aligned row offsets inside the single packed input slab.
    a_row_off = _round_up(obs_dim, 8)
    feat_rows = _round_up(a_row_off + action_dim, 8)

    # Batch tile: multiple of 128 (lane dim), capped by tile_b / padded batch.
    eff_tile = max(128, min(_round_up(tile_b, 128), _round_up(B, 128)))
    b_pad = _round_up(B, eff_tile)
    # v7x megacore: if there would be a single grid step, split it in two
    # (only when the half is still a multiple of 128) so both TCs get work.
    if b_pad // eff_tile == 1 and eff_tile % 256 == 0:
        eff_tile //= 2
        b_pad = _round_up(B, eff_tile)
    grid = (b_pad // eff_tile,)

    # Single feature-major input slab: rows [0:obs_dim) = x^T,
    # rows [a_row_off:a_row_off+action_dim) = a^T, zero padding elsewhere.
    xa = jnp.zeros((feat_rows, b_pad), jnp.float32)
    xa = xa.at[0:obs_dim, 0:B].set(x.T.astype(jnp.float32))
    xa = xa.at[a_row_off:a_row_off + action_dim, 0:B].set(
        a.T.astype(jnp.float32))

    kernel = _make_critic_kernel(obs_dim, action_dim, offs, a_row_off)

    out = pl.pallas_call(
        kernel,
        out_shape=jax.ShapeDtypeStruct((1, b_pad), jnp.float32),
        grid=grid,
        in_specs=[
            pl.BlockSpec((feat_rows, eff_tile), lambda i: (0, i)),
            # Constant index_map: params DMA'd once, VMEM-resident across steps.
            pl.BlockSpec((n_rows, pack_cols), lambda i: (0, 0)),
        ],
        out_specs=pl.BlockSpec((1, eff_tile), lambda i: (0, i)),
        compiler_params=pltpu.CompilerParams(
            dimension_semantics=("parallel",)),  # megacore sharding on v7x
    )(xa, packed_params)

    return out[0, :B].reshape(B, 1)


def init_critic_params(key, obs_dim, action_dim):
    """Deterministic init mirroring nn.Linear default U(-1/sqrt(fan_in), +).

    Weights are stored (in, out) (transposed relative to PyTorch) so the
    plain-JAX reference computes y = x @ W + b.
    """
    dims = [
        ("w1", "b1", obs_dim, _H1),
        ("w2", "b2", _H1 + action_dim, _H2),
        ("w3", "b3", _H2, _H3),
        ("w4", "b4", _H3, _H4),
        ("w5", "b5", _H4, 1),
    ]
    params = {}
    for wname, bname, fan_in, fan_out in dims:
        key, kw, kb = jax.random.split(key, 3)
        bound = 1.0 / jnp.sqrt(jnp.float32(fan_in))
        params[wname] = jax.random.uniform(
            kw, (fan_in, fan_out), jnp.float32, -bound, bound)
        params[bname] = jax.random.uniform(
            kb, (1, fan_out), jnp.float32, -bound, bound)
    return params


def critic_reference(x, a, params):
    """Plain-JAX reference for validation (row-major, matches PyTorch)."""
    h = jnp.maximum(x @ params["w1"] + params["b1"], 0.0)
    xa = jnp.concatenate([h, a], axis=1)
    h = jnp.maximum(xa @ params["w2"] + params["b2"], 0.0)
    h = jnp.maximum(h @ params["w3"] + params["b3"], 0.0)
    h = jnp.maximum(h @ params["w4"] + params["b4"], 0.0)
    return h @ params["w5"] + params["b5"]


if __name__ == "__main__":
    key = jax.random.PRNGKey(0)
    # B=300 is not a multiple of 128 (exercises batch padding); tile_b=128
    # gives a 3-step batch grid so pipelining / megacore sharding is exercised.
    B, obs_dim, action_dim = 300, 16, 4

    kp, kx, ka = jax.random.split(key, 3)
    params = init_critic_params(kp, obs_dim, action_dim)
    packed = pack_critic_params(params)   # packed once, reused every forward
    x = jax.random.normal(kx, (B, obs_dim), jnp.float32)
    a = jax.random.normal(ka, (B, action_dim), jnp.float32)

    q = critic_forward(x, a, packed, tile_b=128)
    q = jax.block_until_ready(q)

    q_ref = critic_reference(x, a, params)
    assert q.shape == (B, 1)
    assert jnp.allclose(q, q_ref, atol=1e-4, rtol=1e-4), "mismatch vs reference"

    print("KERNEL_OK")
</pallas_src>

<mosaic_0001>
module attributes {stable_mosaic.version = 11 : i64} {
  func.func @kernel(%arg0: i32, %arg1: memref<24x128xf32, #tpu.memory_space<vmem>>, %arg2: memref<216x20xf32, #tpu.memory_space<vmem>>, %arg3: memref<1x128xf32, #tpu.memory_space<vmem>>) attributes {dimension_semantics = [#tpu.dimension_semantics<parallel>], iteration_bounds = array<i64: 3>, scalar_prefetch = 0 : i64, scratch_operands = 0 : i64, tpu.core_type = #tpu.core_type<tc>, window_params = [{transform_indices = @transform_0, window_bounds = array<i64: 24, 128>}, {pipeline_mode = #tpu.pipeline_mode<synchronous>, transform_indices = @transform_1, window_bounds = array<i64: 216, 20>}, {transform_indices = @transform_2, window_bounds = array<i64: 1, 128>}]} {
    %c0 = arith.constant 0 : index
    %c0_0 = arith.constant 0 : index
    %0 = vector.load %arg1[%c0, %c0_0] : memref<24x128xf32, #tpu.memory_space<vmem>>, vector<16x128xf32>
    %c16 = arith.constant 16 : index
    %c0_1 = arith.constant 0 : index
    %1 = vector.load %arg1[%c16, %c0_1] : memref<24x128xf32, #tpu.memory_space<vmem>>, vector<4x128xf32>
    %c0_2 = arith.constant 0 : index
    %c0_3 = arith.constant 0 : index
    %2 = vector.load %arg2[%c0_2, %c0_3] : memref<216x20xf32, #tpu.memory_space<vmem>>, vector<20x16xf32>
    %c24 = arith.constant 24 : index
    %c0_4 = arith.constant 0 : index
    %3 = vector.load %arg2[%c24, %c0_4] : memref<216x20xf32, #tpu.memory_space<vmem>>, vector<20x20xf32>
    %c48 = arith.constant 48 : index
    %c0_5 = arith.constant 0 : index
    %4 = vector.load %arg2[%c48, %c0_5] : memref<216x20xf32, #tpu.memory_space<vmem>>, vector<20x4xf32>
    %c72 = arith.constant 72 : index
    %c0_6 = arith.constant 0 : index
    %5 = vector.load %arg2[%c72, %c0_6] : memref<216x20xf32, #tpu.memory_space<vmem>>, vector<20x20xf32>
    %c96 = arith.constant 96 : index
    %c0_7 = arith.constant 0 : index
    %6 = vector.load %arg2[%c96, %c0_7] : memref<216x20xf32, #tpu.memory_space<vmem>>, vector<10x20xf32>
    %c112 = arith.constant 112 : index
    %c0_8 = arith.constant 0 : index
    %7 = vector.load %arg2[%c112, %c0_8] : memref<216x20xf32, #tpu.memory_space<vmem>>, vector<1x10xf32>
    %c120 = arith.constant 120 : index
    %c0_9 = arith.constant 0 : index
    %8 = vector.load %arg2[%c120, %c0_9] : memref<216x20xf32, #tpu.memory_space<vmem>>, vector<20x1xf32>
    %c144 = arith.constant 144 : index
    %c0_10 = arith.constant 0 : index
    %9 = vector.load %arg2[%c144, %c0_10] : memref<216x20xf32, #tpu.memory_space<vmem>>, vector<20x1xf32>
    %c168 = arith.constant 168 : index
    %c0_11 = arith.constant 0 : index
    %10 = vector.load %arg2[%c168, %c0_11] : memref<216x20xf32, #tpu.memory_space<vmem>>, vector<20x1xf32>
    %c192 = arith.constant 192 : index
    %c0_12 = arith.constant 0 : index
    %11 = vector.load %arg2[%c192, %c0_12] : memref<216x20xf32, #tpu.memory_space<vmem>>, vector<10x1xf32>
    %c208 = arith.constant 208 : index
    %c0_13 = arith.constant 0 : index
    %12 = vector.load %arg2[%c208, %c0_13] : memref<216x20xf32, #tpu.memory_space<vmem>>, vector<1x1xf32>
    %cst = arith.constant dense<0.000000e+00> : vector<20x128xf32>
    %13 = tpu.matmul %2, %0, %cst {dimension_numbers = #tpu.dot_dimension_numbers<[1], [0], [0], [1], [0, 0, 1, 1], [], []>} : vector<20x16xf32>, vector<16x128xf32>, vector<20x128xf32> -> vector<20x128xf32>
    %14 = vector.broadcast %8 : vector<20x1xf32> to vector<20x128xf32>
    %15 = arith.addf %13, %14 : vector<20x128xf32>
    %cst_14 = arith.constant 0.000000e+00 : f32
    %16 = vector.broadcast %cst_14 : f32 to vector<20x128xf32>
    %17 = arith.maximumf %15, %16 : vector<20x128xf32>
    %cst_15 = arith.constant dense<0.000000e+00> : vector<20x128xf32>
    %18 = tpu.matmul %3, %17, %cst_15 {dimension_numbers = #tpu.dot_dimension_numbers<[1], [0], [0], [1], [0, 0, 1, 1], [], []>} : vector<20x20xf32>, vector<20x128xf32>, vector<20x128xf32> -> vector<20x128xf32>
    %cst_16 = arith.constant dense<0.000000e+00> : vector<20x128xf32>
    %19 = tpu.matmul %4, %1, %cst_16 {dimension_numbers = #tpu.dot_dimension_numbers<[1], [0], [0], [1], [0, 0, 1, 1], [], []>} : vector<20x4xf32>, vector<4x128xf32>, vector<20x128xf32> -> vector<20x128xf32>
    %20 = arith.addf %18, %19 : vector<20x128xf32>
    %21 = vector.broadcast %9 : vector<20x1xf32> to vector<20x128xf32>
    %22 = arith.addf %20, %21 : vector<20x128xf32>
    %cst_17 = arith.constant 0.000000e+00 : f32
    %23 = vector.broadcast %cst_17 : f32 to vector<20x128xf32>
    %24 = arith.maximumf %22, %23 : vector<20x128xf32>
    %cst_18 = arith.constant dense<0.000000e+00> : vector<20x128xf32>
    %25 = tpu.matmul %5, %24, %cst_18 {dimension_numbers = #tpu.dot_dimension_numbers<[1], [0], [0], [1], [0, 0, 1, 1], [], []>} : vector<20x20xf32>, vector<20x128xf32>, vector<20x128xf32> -> vector<20x128xf32>
    %26 = vector.broadcast %10 : vector<20x1xf32> to vector<20x128xf32>
    %27 = arith.addf %25, %26 : vector<20x128xf32>
    %cst_19 = arith.constant 0.000000e+00 : f32
    %28 = vector.broadcast %cst_19 : f32 to vector<20x128xf32>
    %29 = arith.maximumf %27, %28 : vector<20x128xf32>
    %cst_20 = arith.constant dense<0.000000e+00> : vector<10x128xf32>
    %30 = tpu.matmul %6, %29, %cst_20 {dimension_numbers = #tpu.dot_dimension_numbers<[1], [0], [0], [1], [0, 0, 1, 1], [], []>} : vector<10x20xf32>, vector<20x128xf32>, vector<10x128xf32> -> vector<10x128xf32>
    %31 = vector.broadcast %11 : vector<10x1xf32> to vector<10x128xf32>
    %32 = arith.addf %30, %31 : vector<10x128xf32>
    %cst_21 = arith.constant 0.000000e+00 : f32
    %33 = vector.broadcast %cst_21 : f32 to vector<10x128xf32>
    %34 = arith.maximumf %32, %33 : vector<10x128xf32>
    %cst_22 = arith.constant dense<0.000000e+00> : vector<1x128xf32>
    %35 = tpu.matmul %7, %34, %cst_22 {dimension_numbers = #tpu.dot_dimension_numbers<[1], [0], [0], [1], [0, 0, 1, 1], [], []>} : vector<1x10xf32>, vector<10x128xf32>, vector<1x128xf32> -> vector<1x128xf32>
    %36 = vector.broadcast %12 : vector<1x1xf32> to vector<1x128xf32>
    %37 = arith.addf %35, %36 : vector<1x128xf32>
    %c0_23 = arith.constant 0 : index
    %c0_24 = arith.constant 0 : index
    %38 = vector.load %arg3[%c0_23, %c0_24] : memref<1x128xf32, #tpu.memory_space<vmem>>, vector<1x128xf32>
    tpu.vector_store %arg3[%c0_23, %c0_24], %37 {strides = array<i32>} : memref<1x128xf32, #tpu.memory_space<vmem>>, vector<1x128xf32>,
    return
  }
  func.func @transform_0(%arg0: i32) -> (i32, i32) {
    %c0_i32 = arith.constant 0 : i32
    %c0_i32_0 = arith.constant 0 : i32
    return %c0_i32, %arg0 : i32, i32
  }
  func.func @transform_1(%arg0: i32) -> (i32, i32) {
    %c0_i32 = arith.constant 0 : i32
    %c0_i32_0 = arith.constant 0 : i32
    %c0_i32_1 = arith.constant 0 : i32
    return %c0_i32, %c0_i32_0 : i32, i32
  }
  func.func @transform_2(%arg0: i32) -> (i32, i32) {
    %c0_i32 = arith.constant 0 : i32
    %c0_i32_0 = arith.constant 0 : i32
    return %c0_i32, %arg0 : i32, i32
  }
}

</mosaic_0001>

<bundles_post_ra>
// kernel: tpu_custom_call.1
= control target key start
LH: loop header
LB: loop body
LE: loop exit
PB: predicated region body
PF: predicated region fallthrough
CT: control target
= control target key end

     0   :  { %7 = vsyncpa [#allocation4], 0  ;;  %s918_s0 = inlined_call_operand.vmem [shape: f32[24,384], index: 0, kind: input, shape index: {}]   ;;  %s919_s1 = inlined_call_operand.vmem [shape: f32[216,20], index: 1, kind: input, shape index: {}]   ;;  %s920_s2 = inlined_call_operand.hbm [shape: f32[1,384], index: 2, kind: output, shape index: {}]  }
   0x1   :  { %9 = vsyncpa [#allocation4 + $0x1], 0  ;;  %s729_s9 = smov 0   ;;  %s731_s10 = smov 0  }
   0x2   :  { %s733_s11 = smov 0   ;;  %s735_s12 = smov 0  }
   0x3 LB: > { %s575_s13 = sadd.s32 4294967295, %s711_s12   ;;  %s576_s14 = sadd.s32 4294967294, %s711_s12   ;;  %s711_s12 = sphi %s735_s12, %s926_s12   ;;  %s707_s11 = sphi %s733_s11, %s925_s11   ;;  %s703_s10 = sphi %s731_s10, %s924_s10   ;;  %s699_s9 = sphi %s729_s9, %s923_s9  }
   0x4   : > { %s752_s15 = sadd.s32 1, %s711_s12   ;;  %s22_s16 = sadd.s32 1, %s707_s11 }
   0x5   : > { %s19_s17 = ssub.s32 %s711_s12, %s752_s15  ;;  %p29_p0 = scmp.ne.s32.totalorder %s707_s11, %s703_s10 }
   0x6   : > { %p20_p1 = scmp.eq.s32.totalorder %s19_s17, 0  ;;  %p30_p2 = scmp.eq.s32.totalorder %s711_s12, 0 }
   0x7   : > { %p80_p3 = scmp.eq.s32.totalorder %s575_s13, 2  ;;  %p85_p4 = scmp.ne.s32.totalorder %s703_s10, %s699_s9 }
   0x8   : > { %s765_s18 = scalar_select %p20_p1, %s707_s11, %s22_s16  }
   0x9   : > { %p31_p5 = por %p30_p2, %p29_p0  ;;  %p767_p6 = por %p80_p3, %p29_p0 }
   0xa   : > { %p86_p7 = scmp.eq.s32.totalorder %s576_s14, 2  ;;  %p578_p9 = scmp.ge.s32.totalorder %s711_s12, 3 }
   0xc   : > { %p771_p8 = por %p86_p7, %p85_p4  ;;  %105 = sbr.rel (%p578_p9) target bundleno = 24 (0x18), region = 20 }
  0x11   : > { %108 = sbr.rel (!%p31_p5) target bundleno = 24 (0x18), region = 24  ;;  %s110_s21 = sand.u32 (%p31_p5), 1, %s707_s11  }
  0x12   : > { %s579_s22 = sshll.u32 (%p31_p5), %s711_s12, 3  ;;  %s604_s23 = smul.u32 (%p31_p5), 24, %s110_s21 }
  0x13   : > { %s114_s26 = scalar_lea.vmem (%p31_p5), %s918_s0, %s579_s22 }
  0x14   : > { %v147_v0 = vld [vmem:[%s114_s26] sm:$0xff] (%p31_p5)  ;;  %v149_v1 = vld [vmem:[%s114_s26 + $0x18] sm:$0xff] (%p31_p5)  ;;  %v151_v2 = vld [vmem:[%s114_s26 + $0x30] sm:$0xff] (%p31_p5)  ;;  %s112_s27 = scalar_lea.vmem (%p31_p5), [#allocation2], %s604_s23 }
  0x15   : > { %148 = vst [vmem:[%s112_s27] sm:$0xff] (%p31_p5), %v147_v0 }
  0x16   : > { %150 = vst [vmem:[%s112_s27 + $0x8] sm:$0xff] %v149_v1 }
  0x17   : > { %152 = vst [vmem:[%s112_s27 + $0x10] sm:$0xff] %v151_v2 }
  0x18 PF: > { %p580_p10 = scmp.ge.s32.totalorder %s711_s12, 1  ;;  %p157_p11 = scmp.lt.s32.totalorder %s711_s12, 4 }
  0x1a   : > { %p158_p12 = pnand %p580_p10, %p157_p11 }
  0x1b   : > { %s787_s30 = sand.u32 (!%p158_p12), 1, %s703_s10   ;;  %s511_s5 = scalar_lea.hbm (!%p158_p12), %s920_s2, %s575_s13 }
  0x1c   : > { %161 = sbr.rel (%p158_p12) target bundleno = 778 (0x30a), region = 62  ;;  %s183_s7 = scalar_lea.vmem (!%p158_p12), [#allocation3], %s787_s30 }
  0x1d   : > { %s605_s3 = smul.u32 (!%p158_p12), 24, %s787_s30  ;;  %s513_s8 = sshll.u32 (!%p158_p12), %s183_s7, 4  ;;  %s514_s8 = int_to_ptr.vmem [resolvable:$true] %s513_s8 }
  0x1e   : > { %s515_s14 = sshll.u32 (!%p158_p12), %s511_s5, 4  ;;  %s503_s16 = scalar_lea.sflag (!%p158_p12), [#allocation4], %s787_s30  ;;  %s516_s14 = int_to_ptr.hbm [resolvable:$true] %s515_s14 }
  0x1f   : > { %s166_s6 = scalar_lea.vmem (!%p158_p12), [#allocation2], %s605_s3  ;;  %s663_s17 = sshra.s32 (!%p158_p12), %s516_s14, 4  ;;  %s664_s17 = int_to_ptr.hbm [resolvable:$true] %s663_s17 }
  0x20   : > { %s665_s21 = scalar_lea.hbm (!%p158_p12), %s664_s17, 1  ;;  %s669_s13 = scalar_lea.hbm (!%p158_p12), %s920_s2, 3 }
  0x21   : > { %v204_v3 = vld [vmem:[%s919_s1 + $0x88] sm:$0xf]  ;;  %v713_v4 = vmov 0   ;;  %v202_v5 = vld [vmem:[%s919_s1 + $0x78] sm:$0xff]  ;;  %v187_v8 = vld [vmem:[%s919_s1] sm:$0xff]  ;;  %vm229_vm0 = vcmask 130048   ;;  %p666_p13 = scmp.ne.s32.totalorder %s664_s17, %s665_s21  ;;  %p670_p2 = scmp.lt.s32.totalorder %s664_s17, %s920_s2 }
  0x22   : > { %646 = vset.pattern.permute.xlu0 %v713_v4  ;;  %647 = vset.pattern.permute.xlu1 %v713_v4  ;;  %v185_v6 = vld [vmem:[%s166_s6 + $0x8] sm:$0xff]  ;;  %v184_v7 = vld [vmem:[%s166_s6] sm:$0xff]  ;;  %v209_v13 = vld [vmem:[%s919_s1 + $0xb0] sm:$0xff]  ;;  %vm278_vm1 = vcmask 1043456   ;;  %vm268_vm2 = vcmask 31744   ;;  %vm308_vm3 = vcmask 162816   ;;  %p671_p3 = scmp.lt.s32.totalorder %s669_s13, %s665_s21 }
  0x23   : > { %226 = vperm.xlu0 %646, %v204_v3   ;;  %216 = vperm.xlu1 %647, %v202_v5   ;;  %v203_v9 = vld [vmem:[%s919_s1 + $0x80] sm:$0xff]  ;;  %v188_v11 = vld [vmem:[%s919_s1 + $0x8] sm:$0xff]  ;;  %v210_v12 = vld [vmem:[%s919_s1 + $0xb8] sm:$0xf]  ;;  %vm477_vm4 = vcmask 1041408   ;;  %vm473_vm5 = vcmask 80896   ;;  %p667_p0 = pnand %p666_p13, %p767_p6 }
  0x24   : > { %648 = vset.pattern.permute.xlu2 %v713_v4  ;;  %253 = vmatpush.msra.mxu0 %v185_v6  ;;  %v207_v10 = vld [vmem:[%s919_s1 + $0xa0] sm:$0xf]  ;;  %v189_v14 = vld [vmem:[%s919_s1 + $0x10] sm:$0xf]  ;;  %v212_v15 = vld [vmem:[%s919_s1 + $0xc8] sm:$0x3]  ;;  %p672_p4 = por %p671_p3, %p670_p2 }
  0x25   : > { %v211_v16 = vld [vmem:[%s919_s1 + $0xc0] sm:$0xff]  ;;  %v186_v17 = vld [vmem:[%s166_s6 + $0x10] sm:$0xf]  ;;  %v194_v21 = vld [vmem:[%s919_s1 + $0x38] sm:$0xff]  ;;  %p668_p1 = pneg %p667_p0 }
  0x26   : > { %254 = vmatpush.msra.mxu0 %v184_v7  ;;  %603 = vmatpush.msk.msra.mxu2 %vm278_vm1, %v186_v17  ;;  %v195_v18 = vld [vmem:[%s919_s1 + $0x40] sm:$0xf]  ;;  %v193_v19 = vld [vmem:[%s919_s1 + $0x30] sm:$0xff]  ;;  %v206_v24 = vld [vmem:[%s919_s1 + $0x98] sm:$0xff] }
  0x27   : > { %581 = vmatmul.msk.f32.vlgmr.msra.gmra.mxu0 %vm229_vm0, %v187_v8  ;;  %584 = vmatpush.msk.msra.mxu1 %vm278_vm1, %v186_v17  ;;  %v205_v27 = vld [vmem:[%s919_s1 + $0x90] sm:$0xff]  ;;  %v190_v35 = vld [vmem:[%s919_s1 + $0x18] sm:$0xff]  ;;  %v208_v36 = vld [vmem:[%s919_s1 + $0xa8] sm:$0xff]  ;;  %p673_p5 = pnand %p672_p4, %p668_p1 }
  0x28   : > { %587 = vmatmul.msk.f32.vlgmr.msra.gmra.mxu2 %vm268_vm2, %v195_v18  ;;  %585 = vmatmul.msk.f32.vlgmr.msra.gmra.mxu1 %vm268_vm2, %v193_v19  ;;  %v191_v37 = vld [vmem:[%s919_s1 + $0x20] sm:$0xff]  ;;  %v213_v38 = vld [vmem:[%s919_s1 + $0xd0] sm:$0x1]  ;;  %v192_v39 = vld [vmem:[%s919_s1 + $0x28] sm:$0xf] }
  0x29   : > { %354 = vperm.xlu2 %648, %v206_v24   ;;  %v196_v58 = vld [vmem:[%s919_s1 + $0x48] sm:$0xff]  ;;  %v197_v59 = vld [vmem:[%s919_s1 + $0x50] sm:$0xff]  ;;  %v198_v60 = vld [vmem:[%s919_s1 + $0x58] sm:$0xf] }
  0x2a   : > { %v201_v19 = vld [vmem:[%s919_s1 + $0x70] sm:$0x1] }
  0x2b   : > { %221 = vperm.xlu0 %646, %v203_v9   ;;  %359 = vperm.xlu1 %647, %v207_v10   ;;  %v199_v9 = vld [vmem:[%s919_s1 + $0x60] sm:$0xff]  ;;  %v200_v10 = vld [vmem:[%s919_s1 + $0x68] sm:$0x3] }
  0x2f   : > { %582 = vmatmul.msk.f32.gmra.mxu0 %vm229_vm0, %v188_v11 }
  0x30   : > { %586 = vmatmul.msk.f32.gmra.mxu1 %vm268_vm2, %v194_v21 }
  0x31   : > { %349 = vperm.xlu2 %648, %v205_v27  }
  0x33   : > { %380 = vperm.xlu0 %646, %v210_v12   ;;  %375 = vperm.xlu1 %647, %v209_v13  }
  0x37   : > { %583 = vmatmul.msk.f32.gmra.mxu0 %vm229_vm0, %v189_v14 }
  0x39   : > { %370 = vperm.xlu2 %648, %v208_v36  }
  0x3b   : > { %431 = vperm.xlu0 %646, %v212_v15   ;;  %426 = vperm.xlu1 %647, %v211_v16  }
  0x41   : > { %470 = vperm.xlu2 %648, %v213_v38  }
  0x83   : > { %v355_v44 = vpop.permute.xlu2 %354 }
  0x8b   : > { %v350_v53 = vpop.permute.xlu2 %349 }
  0x93   : > { %v371_v4 = vpop.permute.xlu2 %370 }
  0x95   : > { %v227_v22 = vpop.permute.xlu0 %226  ;;  %v217_v30 = vpop.permute.xlu1 %216 }
  0x9d   : > { %v222_v25 = vpop.permute.xlu0 %221  ;;  %v360_v50 = vpop.permute.xlu1 %359 }
  0xa4   : > { %v256_v20 = vpop.f32.mrf.mxu0 }
  0xa5   : > { %v257_v31 = vadd.f32 %v256_v20, %v217_v30  ;;  %v299_v42 = vpop.f32.mrf.mxu1  ;;  %v381_v63 = vpop.permute.xlu0 %380 }
  0xa6   : > { %v376_v0 = vpop.permute.xlu1 %375  ;;  %v471_v20 = vpop.permute.xlu2 %470 }
  0xa7   : > { %v265_v34 = vmax.f32 %v257_v31, 0.0 }
  0xab   : > { %v305_v40 = vpop.f32.mrf.mxu2 }
  0xac   : > { %v259_v23 = vpop.f32.mrf.mxu0 }
  0xad   : > { %v260_v28 = vadd.f32 %v259_v23, %v222_v25  ;;  %v302_v45 = vpop.f32.mrf.mxu1  ;;  %v432_v12 = vpop.permute.xlu0 %431 }
  0xae   : > { %v427_v13 = vpop.permute.xlu1 %426 }
  0xaf   : > { %v266_v33 = vmax.f32 %v260_v28, 0.0 }
  0xb4   : > { %v262_v26 = vpop.f32.mrf.mxu0 }
  0xb5   : > { %v263_v29 = vadd.f32 %v262_v26, %v227_v22 }
  0xb7   : > { %v267_v32 = vmax.f32 %v263_v29, 0.0 }
  0xb9   : > { %588 = vmatpush.msk.msrb.mxu2 %vm278_vm1, %v267_v32 }
  0xbb   : > { %335 = vmatpush.msrb.mxu2 %v266_v33 }
  0xbd   : > { %336 = vmatpush.msrb.mxu2 %v265_v34 }
  0xbe   : > { %589 = vmatmul.msk.f32.vlgmr.msrb.gmra.mxu2 %vm308_vm3, %v190_v35 }
  0xc6   : > { %590 = vmatmul.msk.f32.gmra.mxu2 %vm308_vm3, %v191_v37 }
  0xce   : > { %591 = vmatmul.msk.f32.gmra.mxu2 %vm308_vm3, %v192_v39 }
 0x141   : > { %v338_v41 = vpop.f32.mrf.mxu2 }
 0x142   : > { %v339_v48 = vadd.f32 %v338_v41, %v299_v42 }
 0x144   : > { %v362_v55 = vadd.f32 %v350_v53, %v339_v48 }
 0x146   : > { %v365_v57 = vmax.f32 %v362_v55, 0.0 }
 0x149   : > { %v341_v43 = vpop.f32.mrf.mxu2 }
 0x14a   : > { %v342_v46 = vadd.f32 %v341_v43, %v302_v45 }
 0x14c   : > { %v363_v52 = vadd.f32 %v355_v44, %v342_v46 }
 0x14e   : > { %v366_v56 = vmax.f32 %v363_v52, 0.0 }
 0x151   : > { %v344_v47 = vpop.f32.mrf.mxu2 }
 0x152   : > { %v345_v49 = vadd.f32 %v344_v47, %v305_v40 }
 0x154   : > { %v364_v51 = vadd.f32 %v360_v50, %v345_v49 }
 0x156   : > { %v367_v54 = vmax.f32 %v364_v51, 0.0 }
 0x158   : > { %592 = vmatpush.msk.msra.mxu3 %vm278_vm1, %v367_v54 }
 0x15a   : > { %409 = vmatpush.msra.mxu3 %v366_v56 }
 0x15c   : > { %410 = vmatpush.msra.mxu3 %v365_v57 }
 0x15d   : > { %593 = vmatmul.msk.f32.vlgmr.msra.gmra.mxu3 %vm308_vm3, %v196_v58 }
 0x165   : > { %594 = vmatmul.msk.f32.gmra.mxu3 %vm308_vm3, %v197_v59 }
 0x16d   : > { %595 = vmatmul.msk.f32.gmra.mxu3 %vm308_vm3, %v198_v60 }
 0x1e0   : > { %v412_v61 = vpop.f32.mrf.mxu3 }
 0x1e1   : > { %v413_v5 = vadd.f32 %v412_v61, %v371_v4 }
 0x1e3   : > { %v421_v8 = vmax.f32 %v413_v5, 0.0 }
 0x1e8   : > { %v415_v62 = vpop.f32.mrf.mxu3 }
 0x1e9   : > { %v416_v2 = vadd.f32 %v415_v62, %v376_v0 }
 0x1eb   : > { %v422_v7 = vmax.f32 %v416_v2, 0.0 }
 0x1f0   : > { %v418_v1 = vpop.f32.mrf.mxu3 }
 0x1f1   : > { %v419_v3 = vadd.f32 %v418_v1, %v381_v63 }
 0x1f3   : > { %v423_v6 = vmax.f32 %v419_v3, 0.0 }
 0x1f5   : > { %596 = vmatpush.msk.msrb.mxu1 %vm278_vm1, %v423_v6 }
 0x1f7   : > { %457 = vmatpush.msrb.mxu1 %v422_v7 }
 0x1f9   : > { %458 = vmatpush.msrb.mxu1 %v421_v8 }
 0x1fa   : > { %597 = vmatmul.msk.f32.vlgmr.msrb.gmra.mxu1 %vm308_vm3, %v199_v9 }
 0x202   : > { %598 = vmatmul.msk.f32.gmra.mxu1 %vm308_vm3, %v200_v10 }
 0x277   : > { %v460_v11 = vpop.f32.mrf.mxu1 }
 0x278   : > { %v461_v15 = vadd.f32 %v460_v11, %v427_v13 }
 0x27a   : > { %v466_v18 = vmax.f32 %v461_v15, 0.0 }
 0x27f   : > { %v463_v14 = vpop.f32.mrf.mxu1 }
 0x280   : > { %v464_v16 = vadd.f32 %v463_v14, %v432_v12 }
 0x282   : > { %v467_v17 = vmax.f32 %v464_v16, 0.0 }
 0x284   : > { %599 = vmatpush.msk.msrb.mxu0 %vm477_vm4, %v467_v17 }
 0x286   : > { %496 = vmatpush.msrb.mxu0 %v466_v18 }
 0x287   : > { %600 = vmatmul.msk.f32.vlgmr.msrb.gmra.mxu0 %vm473_vm5, %v201_v19 }
 0x304   : > { %v498_v21 = vpop.f32.mrf.mxu0 }
 0x305   : > { %v499_v22 = vadd.f32 %v498_v21, %v471_v20 }
 0x307   : > { %501 = vst [vmem:[%s183_s7] sm:$0x1] %v499_v22 }
 0x308   : > { %676 = shalt.err (!%p673_p5)
}
 0x309   : > { %606 = dma.vmem_to_hbm [thread:$0]  (%p767_p6), %s514_s8, 16, %s516_s14, %s503_s16  }
 0x30a PF: > { %p612_p7 = scmp.ge.s32.totalorder %s711_s12, 2  ;;  %s527_s30 = sand.u32 1, %s699_s9  }
 0x30b   : > { %s528_s25 = scalar_lea.sflag [#allocation4], %s527_s30 }
 0x30c   : > { %p609_p9 = pnand %p612_p7, %p771_p8 }
 0x30e   : > { %p610_p10 = pneg %p609_p9 }
 0x310   : > { %694 = dma.done.wait (%p610_p10), %s528_s25, 16  }
 0x311   : > { %696 = vsyncadd (%p610_p10), %s528_s25, 4294967280  ;;  %p12_p11 = scmp.ge.s32.totalorder %s752_s15, 5   ;;  %s923_s9 = smov %s703_s10 }
 0x312   : > { %s924_s10 = smov %s707_s11  ;;  %s925_s11 = smov %s765_s18 }
 0x313   : > { %s926_s12 = smov %s752_s15  ;;  %14 = sbr.rel (!%p12_p11) target bundleno = 3 (0x3), region = 106 }
 0x318   :  { %533 = vsyncpa [#allocation4], 1 }
 0x319   :  { %535 = vsyncpa [#allocation4 + $0x1], 1 }

</bundles_post_ra>
